<compile_context>
chip_gen: v5e
topology: v5e:2x2
jax: 0.10.0
libtpu: 0.0.40
codegen_flags: <defaults>
</compile_context>

<pallas_src>
import math

import jax
import jax.numpy as jnp
from jax.experimental import pallas as pl
from jax.experimental.pallas import tpu as pltpu


def _gol3_kernel(n_ref, s_ref, out_ref):
    n = n_ref[...]
    s = s_ref[...]
    # ((s==1) & ((n==1)|(n==3))) | ((s==0) & (n==3))  -> 1.0 else 0.0
    cond = ((s == 1) & ((n == 1) | (n == 3))) | ((s == 0) & (n == 3))
    out_ref[...] = cond.astype(jnp.float32)


def _round_up(x: int, m: int) -> int:
    return ((x + m - 1) // m) * m


def _vmem_budget_bytes() -> int:
    # Conservative default (12 MiB double-buffered working set fits the
    # 16 MiB scoped-VMEM default on v5e and older); bump to 24 MiB on
    # v6e / v7x whose scoped default is 32 MiB.
    try:
        kind = jax.devices()[0].device_kind.lower()
    except Exception:
        kind = ""
    if ("v6" in kind) or ("v7" in kind):
        return 24 << 20
    return 12 << 20


def _pick_layout(total: int, shape) -> tuple[int, int, int]:
    """Return (rows, lane, pad_elems) for a lane-dense (rows, lane) view."""
    # Common case: trailing dim already 128-aligned -> zero-copy view.
    if len(shape) >= 2 and shape[-1] % 128 == 0:
        lane = shape[-1]
        return total // lane, lane, 0
    # Total size 128-aligned -> zero-copy flat view with the widest lane
    # that divides it.
    if total % 128 == 0:
        for lane in (2048, 1024, 512, 256, 128):
            if total % lane == 0:
                return total // lane, lane, 0
    # Fallback: minimal pad to the 128-lane boundary (< 128 extra elements).
    lane = 128
    padded = _round_up(total, lane)
    return padded // lane, lane, padded - total


def _pick_tile_rows(rows: int, lane: int, budget_bytes: int) -> int:
    # Per grid step: 3 arrays (2 inputs + 1 output) x 2 pipeline buffers, f32.
    per_row = 6 * lane * 4
    max_rows = max(8, (budget_bytes // per_row) // 8 * 8)
    if rows <= max_rows:
        if rows >= 16:
            # Keep >= 2 grid steps so the "parallel" axis can actually be
            # sharded across both TensorCores on v7x.
            return min(max_rows, _round_up(-(-rows // 2), 8))
        return rows  # single full-extent block (exact-dim blocks are legal)
    return max_rows


def game_of_life3_layer(neighbors: jax.Array, current_state: jax.Array) -> jax.Array:
    assert neighbors.shape == current_state.shape
    orig_shape = neighbors.shape
    total = math.prod(orig_shape)

    rows, lane, pad = _pick_layout(total, orig_shape)

    n_flat = neighbors.reshape(-1)
    s_flat = current_state.reshape(-1)
    if pad:
        # Only for misaligned sizes; zero padding is harmless ((n=0,s=0)->0)
        # and is sliced off below.
        n_flat = jnp.pad(n_flat, (0, pad))
        s_flat = jnp.pad(s_flat, (0, pad))
    n2 = n_flat.reshape(rows, lane)
    s2 = s_flat.reshape(rows, lane)

    tile_rows = _pick_tile_rows(rows, lane, _vmem_budget_bytes())
    grid = (pl.cdiv(rows, tile_rows),)  # partial last block handled by Pallas
    block = pl.BlockSpec((tile_rows, lane), lambda i: (i, 0))

    out2 = pl.pallas_call(
        _gol3_kernel,
        out_shape=jax.ShapeDtypeStruct((rows, lane), jnp.float32),
        grid=grid,
        in_specs=[block, block],
        out_specs=block,
        compiler_params=pltpu.CompilerParams(
            dimension_semantics=("parallel",),
        ),
        cost_estimate=pl.CostEstimate(
            flops=6 * total, transcendentals=0, bytes_accessed=12 * total
        ),
    )(n2, s2)

    out_flat = out2.reshape(-1)
    if pad:
        out_flat = out_flat[:total]
    out = out_flat.reshape(orig_shape)
    # unsqueeze(1) -- pure reshape glue outside the kernel.
    return jnp.expand_dims(out, 1)


if __name__ == "__main__":
    key = jax.random.PRNGKey(0)
    k1, k2 = jax.random.split(key)
    B, H, W = 2, 16, 16
    # Neighbor counts 0..8 and binary state, as float32 (what PyTorch passes).
    neighbors = jax.random.randint(k1, (B, H, W), 0, 9).astype(jnp.float32)
    current_state = jax.random.randint(k2, (B, H, W), 0, 2).astype(jnp.float32)

    out = game_of_life3_layer(neighbors, current_state)
    jax.block_until_ready(out)

    # Plain-JAX reference (mirrors the nested torch.where exactly).
    cond = ((current_state == 1) & ((neighbors == 1) | (neighbors == 3))) | (
        (current_state == 0) & (neighbors == 3)
    )
    ref = jnp.where(cond, 1.0, 0.0)[:, None, ...]

    assert out.shape == (B, 1, H, W)
    assert out.dtype == jnp.float32
    assert jnp.array_equal(out, ref)

    print("KERNEL_OK")
</pallas_src>

<mosaic_0001>
module attributes {stable_mosaic.version = 11 : i64} {
  func.func @_gol3_kernel(%arg0: i32, %arg1: memref<1x512xf32, #tpu.memory_space<vmem>>, %arg2: memref<1x512xf32, #tpu.memory_space<vmem>>, %arg3: memref<1x512xf32, #tpu.memory_space<vmem>>) attributes {dimension_semantics = [#tpu.dimension_semantics<parallel>], iteration_bounds = array<i64: 1>, scalar_prefetch = 0 : i64, scratch_operands = 0 : i64, tpu.core_type = #tpu.core_type<tc>, window_params = [{transform_indices = @transform_0, window_bounds = array<i64: 1, 512>}, {transform_indices = @transform_1, window_bounds = array<i64: 1, 512>}, {transform_indices = @transform_2, window_bounds = array<i64: 1, 512>}]} {
    %c0 = arith.constant 0 : index
    %c0_0 = arith.constant 0 : index
    %0 = vector.load %arg1[%c0, %c0_0] : memref<1x512xf32, #tpu.memory_space<vmem>>, vector<1x512xf32>
    %c0_1 = arith.constant 0 : index
    %c0_2 = arith.constant 0 : index
    %1 = vector.load %arg2[%c0_1, %c0_2] : memref<1x512xf32, #tpu.memory_space<vmem>>, vector<1x512xf32>
    %cst = arith.constant 1.000000e+00 : f32
    %2 = vector.broadcast %cst : f32 to vector<1x512xf32>
    %3 = arith.cmpf oeq, %1, %2 : vector<1x512xf32>
    %cst_3 = arith.constant 1.000000e+00 : f32
    %4 = vector.broadcast %cst_3 : f32 to vector<1x512xf32>
    %5 = arith.cmpf oeq, %0, %4 : vector<1x512xf32>
    %cst_4 = arith.constant 3.000000e+00 : f32
    %6 = vector.broadcast %cst_4 : f32 to vector<1x512xf32>
    %7 = arith.cmpf oeq, %0, %6 : vector<1x512xf32>
    %8 = arith.ori %5, %7 : vector<1x512xi1>
    %9 = arith.andi %3, %8 : vector<1x512xi1>
    %cst_5 = arith.constant 0.000000e+00 : f32
    %10 = vector.broadcast %cst_5 : f32 to vector<1x512xf32>
    %11 = arith.cmpf oeq, %1, %10 : vector<1x512xf32>
    %cst_6 = arith.constant 3.000000e+00 : f32
    %12 = vector.broadcast %cst_6 : f32 to vector<1x512xf32>
    %13 = arith.cmpf oeq, %0, %12 : vector<1x512xf32>
    %14 = arith.andi %11, %13 : vector<1x512xi1>
    %15 = arith.ori %9, %14 : vector<1x512xi1>
    %16 = arith.extui %15 : vector<1x512xi1> to vector<1x512xi32>
    %17 = arith.sitofp %16 : vector<1x512xi32> to vector<1x512xf32>
    %c0_7 = arith.constant 0 : index
    %c0_8 = arith.constant 0 : index
    %18 = vector.load %arg3[%c0_7, %c0_8] : memref<1x512xf32, #tpu.memory_space<vmem>>, vector<1x512xf32>
    tpu.vector_store %arg3[%c0_7, %c0_8], %17 {strides = array<i32>} : memref<1x512xf32, #tpu.memory_space<vmem>>, vector<1x512xf32>,
    return
  }
  func.func @transform_0(%arg0: i32) -> (i32, i32) {
    %c0_i32 = arith.constant 0 : i32
    %c0_i32_0 = arith.constant 0 : i32
    return %arg0, %c0_i32 : i32, i32
  }
  func.func @transform_1(%arg0: i32) -> (i32, i32) {
    %c0_i32 = arith.constant 0 : i32
    %c0_i32_0 = arith.constant 0 : i32
    return %arg0, %c0_i32 : i32, i32
  }
  func.func @transform_2(%arg0: i32) -> (i32, i32) {
    %c0_i32 = arith.constant 0 : i32
    %c0_i32_0 = arith.constant 0 : i32
    return %arg0, %c0_i32 : i32, i32
  }
}

</mosaic_0001>

<bundles_post_ra>
// kernel: tpu_custom_call.1
= control target key start
LH: loop header
LB: loop body
LE: loop exit
PB: predicated region body
PF: predicated region fallthrough
CT: control target
= control target key end

     0   :  { %7 = vsyncpa [#allocation3], 0  ;;  %s186_s0 = inlined_call_operand.hbm [shape: f32[1,512], index: 0, kind: input, shape index: {}]   ;;  %s187_s1 = inlined_call_operand.hbm [shape: f32[1,512], index: 1, kind: input, shape index: {}]   ;;  %s188_s2 = inlined_call_operand.hbm [shape: f32[1,512], index: 2, kind: output, shape index: {}]  }
   0x1   :  { %8 = vsyncpa [#allocation6], 0 }
   0x2   :  { %9 = vsyncpa [#allocation4], 0  ;;  %s15_s11 = sshll.u32 %s186_s0, 4  ;;  %s158_s12 = smov [#allocation2]   ;;  %s16_s11 = int_to_ptr.hbm [resolvable:$true] %s15_s11 }
   0x3   :  { %s17_s13 = sshll.u32 %s158_s12, 4  ;;  %s26_s16 = sshll.u32 %s187_s1, 4  ;;  %s18_s13 = int_to_ptr.vmem [resolvable:$true] %s17_s13  ;;  %s27_s16 = int_to_ptr.hbm [resolvable:$true] %s26_s16 }
   0x4   :  { %20 = dma.hbm_to_vmem [thread:$0]  %s16_s11, 64, %s18_s13, [#allocation3]  }
   0x5   :  { %s159_s17 = smov [#allocation5]  }
   0x6   :  { %s28_s18 = sshll.u32 %s159_s17, 4  ;;  %s29_s18 = int_to_ptr.vmem [resolvable:$true] %s28_s18 }
   0x7   :  { %31 = dma.hbm_to_vmem [thread:$0]  %s27_s16, 64, %s29_s18, [#allocation6]  }
   0x8   :  { %152 = dma.done.wait [#allocation3], 64  }
   0x9   :  { %153 = vsyncadd [#allocation3], 4294967232 }
   0xa   :  { %154 = dma.done.wait [#allocation6], 64  }
   0xb   :  { %155 = vsyncadd [#allocation6], 4294967232  ;;  %v40_v0 = vld [vmem:[#allocation2] sm:$0xf]  ;;  %v41_v1 = vld [vmem:[#allocation5] sm:$0xf]  ;;  %v52_v2 = vlaneseq }
   0xc   :  { %vm42_vm0 = vcmp.eq.f32.partialorder %v41_v1, 1.0  ;;  %vm43_vm1 = vcmp.eq.f32.partialorder %v40_v0, 1.0  ;;  %vm44_vm2 = vcmp.eq.f32.partialorder %v40_v0, 3.0  ;;  %vm47_vm3 = vcmp.eq.f32.partialorder %v41_v1, 0.0  ;;  %s160_s0 = smov [#allocation7]   ;;  %s64_s21 = sshll.u32 %s188_s2, 4  ;;  %s65_s21 = int_to_ptr.hbm [resolvable:$true] %s64_s21 }
   0xd   :  { %vm45_vm4 = vmor %vm43_vm1, %vm44_vm2  ;;  %s62_s1 = sshll.u32 %s160_s0, 4  ;;  %vm54_vm7 = vcmp.lt.s32.totalorder %v52_v2, 512  ;;  %v161_v3 = vmov 0.0   ;;  %s63_s1 = int_to_ptr.vmem [resolvable:$true] %s62_s1 }
   0xe   :  { %vm46_vm5 = vmand %vm42_vm0, %vm45_vm4 }
   0xf   :  { %vm48_vm6 = vmand %vm47_vm3, %vm44_vm2 }
  0x10   :  { %vm49_vm8 = vmor %vm46_vm5, %vm48_vm6 }
  0x11   :  { %v75_v4 = vsel %vm49_vm8, 1.0, %v161_v3 }
  0x12   :  { %56 = vst.msk [vmem:[#allocation7] sm:$0xf] %vm54_vm7, %v75_v4 }
  0x13   :  { %67 = dma.vmem_to_hbm [thread:$0]  %s63_s1, 64, %s65_s21, [#allocation4]  }
  0x14   :  { %156 = dma.done.wait [#allocation4], 64  }
  0x15   :  { %157 = vsyncadd [#allocation4], 4294967232 }
  0x16   :  { %72 = vsyncpa [#allocation3], 1 }
  0x17   :  { %73 = vsyncpa [#allocation6], 1 }
  0x18   :  { %74 = vsyncpa [#allocation4], 1 }

</bundles_post_ra>
